<compile_context>
chip_gen: v7x
topology: tpu7x:2x2x1
jax: 0.10.0
libtpu: 0.0.40
codegen_flags: <defaults>
</compile_context>

<pallas_src>
import functools

import jax
import jax.numpy as jnp
from jax.experimental import pallas as pl
from jax.experimental.pallas import tpu as pltpu


def _round_up(n, m):
    return ((n + m - 1) // m) * m


def _fused_mlp_kernel(*refs, num_layers):
    """Fused MLP: h = x; for each layer h = act(h @ W + b).

    refs layout: (x_ref, w0, b0, ..., w_{L-1}, b_{L-1}, o_ref), all VMEM.
      x_ref: (B, D0)             unpadded input (full-array block)
      w_i:   (Di_in, D{i+1}_p)   pre-transposed, lane-padded weights
      b_i:   (1, D{i+1}_p)       lane-padded bias
      o_ref: (B, DL_p)
    ReLU on all layers except the last, which uses Tanh.
    """
    x_ref = refs[0]
    o_ref = refs[-1]
    h = x_ref[...]
    for i in range(num_layers):
        w = refs[1 + 2 * i][...]
        b = refs[2 + 2 * i][...]
        h = jnp.dot(h, w, preferred_element_type=jnp.float32,
                    precision=jax.lax.Precision.HIGHEST) + b
        if i < num_layers - 1:
            h = jnp.maximum(h, 0.0)          # ReLU (VPU)
        else:
            h = jnp.tanh(h)                   # Tanh (EUP)
    o_ref[...] = h.astype(o_ref.dtype)


@functools.partial(jax.jit, static_argnames=("output_dim",))
def _generator_forward_jit(z, layers, output_dim):
    """End-to-end jitted forward: kernel + (no-op) exact-shape slice."""
    B = z.shape[0]
    out_pad = layers[-1][0].shape[1]

    flat = []
    for w, b in layers:
        flat.append(w)
        flat.append(b)

    kernel = functools.partial(_fused_mlp_kernel, num_layers=len(layers))
    out = pl.pallas_call(
        kernel,
        out_shape=jax.ShapeDtypeStruct((B, out_pad), jnp.float32),
        in_specs=[pl.BlockSpec(memory_space=pltpu.MemorySpace.VMEM)]
        * (1 + len(flat)),
        out_specs=pl.BlockSpec(memory_space=pltpu.MemorySpace.VMEM),
    )(z.astype(jnp.float32), *flat)
    # No-op when output_dim is already a multiple of 128; XLA elides it.
    return out[:, :output_dim]


def init_generator_params(key, latent_dim, hidden_dims, output_dim):
    """Deterministic init matching PyTorch nn.Linear layouts (w: (out, in))."""
    dims = [latent_dim] + list(hidden_dims) + [output_dim]
    params = []
    for i in range(len(dims) - 1):
        fan_in, fan_out = dims[i], dims[i + 1]
        key, kw, kb = jax.random.split(key, 3)
        bound = 1.0 / jnp.sqrt(jnp.float32(fan_in))
        w = jax.random.uniform(kw, (fan_out, fan_in), jnp.float32,
                               minval=-bound, maxval=bound)
        b = jax.random.uniform(kb, (fan_out,), jnp.float32,
                               minval=-bound, maxval=bound)
        params.append((w, b))
    return params


def pack_params(params_pt):
    """One-time: transpose to (In, Out) and pad feature dims to mult-of-128.

    Layer 0 keeps its true input (K) dim so the forward never pads z.
    Padding is exact: padded input cols of later layers hit zero weight rows,
    padded output cols get zero weight + zero bias (tanh(0)=0), and the
    wrapper slices back to the true output_dim.
    """
    dims = [params_pt[0][0].shape[1]] + [w.shape[0] for w, _ in params_pt]
    in_dims = [dims[0]] + [_round_up(d, 128) for d in dims[1:-1]]
    out_dims = [_round_up(d, 128) for d in dims[1:]]
    layers = []
    for i, (w_pt, b) in enumerate(params_pt):
        in_d, out_d = dims[i], dims[i + 1]
        in_p, out_p = in_dims[i], out_dims[i]
        w_t = jnp.transpose(w_pt)                               # (In, Out)
        w_pad = jnp.zeros((in_p, out_p), jnp.float32).at[:in_d, :out_d].set(w_t)
        b_pad = jnp.zeros((1, out_p), jnp.float32).at[0, :out_d].set(b)
        layers.append((w_pad, b_pad))
    return {"layers": layers, "output_dim": dims[-1]}


def generator_forward(z, packed):
    """(Linear+ReLU) * len(hidden_dims) then Linear+Tanh, fully fused."""
    return _generator_forward_jit(z, packed["layers"], packed["output_dim"])


def generator_reference(z, params_pt):
    """Pure-JAX reference mirroring the PyTorch module."""
    h = z
    n = len(params_pt)
    for i, (w, b) in enumerate(params_pt):
        h = jnp.dot(h, w.T, precision=jax.lax.Precision.HIGHEST) + b
        h = jnp.maximum(h, 0.0) if i < n - 1 else jnp.tanh(h)
    return h


if __name__ == "__main__":
    latent_dim = 16
    hidden_dims = [32, 64]
    output_dim = 128
    batch = 2

    key = jax.random.PRNGKey(0)
    key, kx = jax.random.split(key)
    z = jax.random.normal(kx, (batch, latent_dim), jnp.float32)

    params_pt = init_generator_params(key, latent_dim, hidden_dims, output_dim)
    packed = pack_params(params_pt)

    out = generator_forward(z, packed)
    out = jax.block_until_ready(out)

    ref = generator_reference(z, params_pt)

    assert out.shape == (batch, output_dim)
    assert out.dtype == jnp.float32
    assert bool(jnp.all(jnp.abs(out) <= 1.0 + 1e-6))
    assert bool(jnp.allclose(out, ref, atol=1e-5, rtol=1e-5))

    print("KERNEL_OK")
</pallas_src>

<mosaic_0001>
module attributes {stable_mosaic.version = 11 : i64} {
  func.func @_fused_mlp_kernel(%arg0: memref<2x16xf32, #tpu.memory_space<vmem>>, %arg1: memref<16x128xf32, #tpu.memory_space<vmem>>, %arg2: memref<1x128xf32, #tpu.memory_space<vmem>>, %arg3: memref<128x128xf32, #tpu.memory_space<vmem>>, %arg4: memref<1x128xf32, #tpu.memory_space<vmem>>, %arg5: memref<128x128xf32, #tpu.memory_space<vmem>>, %arg6: memref<1x128xf32, #tpu.memory_space<vmem>>, %arg7: memref<2x128xf32, #tpu.memory_space<vmem>>) attributes {dimension_semantics = [], scalar_prefetch = 0 : i64, scratch_operands = 0 : i64, tpu.core_type = #tpu.core_type<tc>} {
    %c0 = arith.constant 0 : index
    %c0_0 = arith.constant 0 : index
    %0 = vector.load %arg0[%c0, %c0_0] : memref<2x16xf32, #tpu.memory_space<vmem>>, vector<2x16xf32>
    %c0_1 = arith.constant 0 : index
    %c0_2 = arith.constant 0 : index
    %1 = vector.load %arg1[%c0_1, %c0_2] : memref<16x128xf32, #tpu.memory_space<vmem>>, vector<16x128xf32>
    %c0_3 = arith.constant 0 : index
    %c0_4 = arith.constant 0 : index
    %2 = vector.load %arg2[%c0_3, %c0_4] : memref<1x128xf32, #tpu.memory_space<vmem>>, vector<1x128xf32>
    %cst = arith.constant dense<0.000000e+00> : vector<2x128xf32>
    %3 = tpu.matmul %0, %1, %cst {dimension_numbers = #tpu.dot_dimension_numbers<[1], [0], [0], [1], [0, 0, 1, 1], [], []>, precision = #tpu.contract_precision<fp32>} : vector<2x16xf32>, vector<16x128xf32>, vector<2x128xf32> -> vector<2x128xf32>
    %4 = vector.broadcast %2 : vector<1x128xf32> to vector<2x128xf32>
    %5 = arith.addf %3, %4 : vector<2x128xf32>
    %cst_5 = arith.constant 0.000000e+00 : f32
    %6 = vector.broadcast %cst_5 : f32 to vector<2x128xf32>
    %7 = arith.maximumf %5, %6 : vector<2x128xf32>
    %c0_6 = arith.constant 0 : index
    %c0_7 = arith.constant 0 : index
    %8 = vector.load %arg3[%c0_6, %c0_7] : memref<128x128xf32, #tpu.memory_space<vmem>>, vector<128x128xf32>
    %c0_8 = arith.constant 0 : index
    %c0_9 = arith.constant 0 : index
    %9 = vector.load %arg4[%c0_8, %c0_9] : memref<1x128xf32, #tpu.memory_space<vmem>>, vector<1x128xf32>
    %cst_10 = arith.constant dense<0.000000e+00> : vector<2x128xf32>
    %10 = tpu.matmul %7, %8, %cst_10 {dimension_numbers = #tpu.dot_dimension_numbers<[1], [0], [0], [1], [0, 0, 1, 1], [], []>, precision = #tpu.contract_precision<fp32>} : vector<2x128xf32>, vector<128x128xf32>, vector<2x128xf32> -> vector<2x128xf32>
    %11 = vector.broadcast %9 : vector<1x128xf32> to vector<2x128xf32>
    %12 = arith.addf %10, %11 : vector<2x128xf32>
    %cst_11 = arith.constant 0.000000e+00 : f32
    %13 = vector.broadcast %cst_11 : f32 to vector<2x128xf32>
    %14 = arith.maximumf %12, %13 : vector<2x128xf32>
    %c0_12 = arith.constant 0 : index
    %c0_13 = arith.constant 0 : index
    %15 = vector.load %arg5[%c0_12, %c0_13] : memref<128x128xf32, #tpu.memory_space<vmem>>, vector<128x128xf32>
    %c0_14 = arith.constant 0 : index
    %c0_15 = arith.constant 0 : index
    %16 = vector.load %arg6[%c0_14, %c0_15] : memref<1x128xf32, #tpu.memory_space<vmem>>, vector<1x128xf32>
    %cst_16 = arith.constant dense<0.000000e+00> : vector<2x128xf32>
    %17 = tpu.matmul %14, %15, %cst_16 {dimension_numbers = #tpu.dot_dimension_numbers<[1], [0], [0], [1], [0, 0, 1, 1], [], []>, precision = #tpu.contract_precision<fp32>} : vector<2x128xf32>, vector<128x128xf32>, vector<2x128xf32> -> vector<2x128xf32>
    %18 = vector.broadcast %16 : vector<1x128xf32> to vector<2x128xf32>
    %19 = arith.addf %17, %18 : vector<2x128xf32>
    %20 = math.tanh %19 : vector<2x128xf32>
    %c0_17 = arith.constant 0 : index
    %c0_18 = arith.constant 0 : index
    %21 = vector.load %arg7[%c0_17, %c0_18] : memref<2x128xf32, #tpu.memory_space<vmem>>, vector<2x128xf32>
    tpu.vector_store %arg7[%c0_17, %c0_18], %20 {strides = array<i32>} : memref<2x128xf32, #tpu.memory_space<vmem>>, vector<2x128xf32>,
    return
  }
}

</mosaic_0001>

<bundles_post_ra>
// kernel: _generator_forward_jit.1
= control target key start
LH: loop header
LB: loop body
LE: loop exit
PB: predicated region body
PF: predicated region fallthrough
CT: control target
= control target key end

     0   :  { %12 = vsyncpa [#allocation3], 0  ;;  %s3742_s0 = inlined_call_operand.hbm [shape: f32[2,16], index: 0, kind: input, shape index: {}]   ;;  %s3743_s1 = inlined_call_operand.hbm [shape: f32[16,128], index: 1, kind: input, shape index: {}]   ;;  %s3744_s2 = inlined_call_operand.vmem [shape: f32[1,128], index: 2, kind: input, shape index: {}]   ;;  %s3745_s3 = inlined_call_operand.hbm [shape: f32[128,128], index: 3, kind: input, shape index: {}]   ;;  %s3746_s4 = inlined_call_operand.vmem [shape: f32[1,128], index: 4, kind: input, shape index: {}]   ;;  %s3747_s5 = inlined_call_operand.hbm [shape: f32[128,128], index: 5, kind: input, shape index: {}]   ;;  %s3748_s6 = inlined_call_operand.vmem [shape: f32[1,128], index: 6, kind: input, shape index: {}]   ;;  %s3749_s7 = inlined_call_operand.hbm [shape: f32[2,128], index: 7, kind: output, shape index: {}]  }
   0x1   :  { %13 = vsyncpa [#allocation6], 0 }
   0x2   :  { %14 = vsyncpa [#allocation9], 0 }
   0x3   :  { %15 = vsyncpa [#allocation4], 0  ;;  %s3057_s24 = smov [#allocation5]   ;;  %s2939_s28 = scalar_lea.hbm %s3743_s1, 256 }
   0x4   :  { %s31_s25 = sshll.u32 %s3057_s24, 4  ;;  %p2940_p0 = scmp.ne.s32.totalorder %s3743_s1, %s2939_s28  ;;  %s32_s25 = int_to_ptr.vmem [resolvable:$true] %s31_s25 }
   0x5   :  { %p2943_p1 = scmp.lt.u32.totalorder %s2939_s28, %s3743_s1 }
   0x7   :  { %p2945_p2 = pnand %p2943_p1, %p2940_p0 }
   0x9   :  { %2948 = shalt.err (!%p2945_p2)
}
   0xa   :  { %s2949_s10 = scalar_lea.vmem %s32_s25, 256  ;;  %p2954_p4 = scmp.lt.s32.totalorder %s32_s25, %s32_s25 }
   0xb   :  { %p2950_p3 = scmp.ne.s32.totalorder %s32_s25, %s2949_s10  ;;  %p2955_p5 = scmp.lt.s32.totalorder %s2949_s10, %s2949_s10 }
   0xd   :  { %p2956_p6 = por %p2955_p5, %p2954_p4 }
   0xf   :  { %p2957_p7 = pnand %p2956_p6, %p2950_p3 }
  0x11   :  { %2960 = shalt.err (!%p2957_p7)
}
  0x12   :  { %s3058_s11 = smov 128   ;;  %s3059_s12 = smov 8  }
  0x13   :  { %37 = dma.hbm_to_vmem [thread:$0]  %s3743_s1, 256, %s32_s25, [#allocation6], %s3058_s11, %s3058_s11, %s3059_s12  }
  0x14   :  { %s3060_s15 = smov [#allocation2]   ;;  %s3061_s17 = smov [#allocation7]  }
  0x15   :  { %s22_s16 = sshll.u32 %s3060_s15, 4  ;;  %s45_s18 = sshll.u32 %s3061_s17, 4  ;;  %s23_s16 = int_to_ptr.vmem [resolvable:$true] %s22_s16  ;;  %s46_s18 = int_to_ptr.vmem [resolvable:$true] %s45_s18 }
  0x16   :  { %s2961_s21 = scalar_lea.hbm %s3742_s0, 32 }
  0x17   :  { %p2962_p8 = scmp.ne.s32.totalorder %s3742_s0, %s2961_s21  ;;  %p2965_p9 = scmp.lt.u32.totalorder %s2961_s21, %s3742_s0 }
  0x19   :  { %p2967_p10 = pnand %p2965_p9, %p2962_p8 }
  0x1b   :  { %2970 = shalt.err (!%p2967_p10)
}
  0x1c   :  { %s2971_s1 = scalar_lea.vmem %s23_s16, 32  ;;  %p2976_p12 = scmp.lt.s32.totalorder %s23_s16, %s23_s16 }
  0x1d   :  { %p2972_p11 = scmp.ne.s32.totalorder %s23_s16, %s2971_s1  ;;  %p2977_p13 = scmp.lt.s32.totalorder %s2971_s1, %s2971_s1 }
  0x1f   :  { %p2978_p0 = por %p2977_p13, %p2976_p12 }
  0x21   :  { %p2979_p1 = pnand %p2978_p0, %p2972_p11 }
  0x23   :  { %2982 = shalt.err (!%p2979_p1)
}
  0x24   :  { %25 = dma.hbm_to_vmem [thread:$0]  %s3742_s0, 32, %s23_s16, [#allocation3]  }
  0x25   :  { %s2983_s30 = scalar_lea.hbm %s3745_s3, 2048 }
  0x26   :  { %p2984_p2 = scmp.ne.s32.totalorder %s3745_s3, %s2983_s30  ;;  %p2987_p3 = scmp.lt.u32.totalorder %s2983_s30, %s3745_s3 }
  0x28   :  { %p2989_p4 = pnand %p2987_p3, %p2984_p2 }
  0x2a   :  { %2992 = shalt.err (!%p2989_p4)
}
  0x2b   :  { %s2993_s14 = scalar_lea.vmem %s46_s18, 2048  ;;  %p2998_p6 = scmp.lt.s32.totalorder %s46_s18, %s46_s18 }
  0x2c   :  { %p2994_p5 = scmp.ne.s32.totalorder %s46_s18, %s2993_s14  ;;  %p2999_p7 = scmp.lt.s32.totalorder %s2993_s14, %s2993_s14 }
  0x2e   :  { %p3000_p8 = por %p2999_p7, %p2998_p6 }
  0x30   :  { %p3001_p9 = pnand %p3000_p8, %p2994_p5 }
  0x32   :  { %3004 = shalt.err (!%p3001_p9)
}
  0x33   :  { %51 = dma.hbm_to_vmem [thread:$0]  %s3745_s3, 2048, %s46_s18, [#allocation6], %s3058_s11, %s3058_s11, %s3059_s12  }
  0x34   :  { %s3062_s16 = smov [#allocation8]   ;;  %s3005_s21 = scalar_lea.hbm %s3747_s5, 2048 }
  0x35   :  { %s59_s17 = sshll.u32 %s3062_s16, 4  ;;  %p3006_p10 = scmp.ne.s32.totalorder %s3747_s5, %s3005_s21  ;;  %s60_s17 = int_to_ptr.vmem [resolvable:$true] %s59_s17 }
  0x36   :  { %p3009_p11 = scmp.lt.u32.totalorder %s3005_s21, %s3747_s5 }
  0x38   :  { %p3011_p12 = pnand %p3009_p11, %p3006_p10 }
  0x3a   :  { %3014 = shalt.err (!%p3011_p12)
}
  0x3b   :  { %s3015_s1 = scalar_lea.vmem %s60_s17, 2048  ;;  %p3020_p0 = scmp.lt.s32.totalorder %s60_s17, %s60_s17 }
  0x3c   :  { %p3016_p13 = scmp.ne.s32.totalorder %s60_s17, %s3015_s1  ;;  %p3021_p1 = scmp.lt.s32.totalorder %s3015_s1, %s3015_s1 }
  0x3e   :  { %p3022_p2 = por %p3021_p1, %p3020_p0 }
  0x40   :  { %p3023_p3 = pnand %p3022_p2, %p3016_p13 }
  0x42   :  { %3026 = shalt.err (!%p3023_p3)
}
  0x43   :  { %65 = dma.hbm_to_vmem [thread:$0]  %s3747_s5, 2048, %s60_s17, [#allocation9], %s3058_s11, %s3058_s11, %s3059_s12  }
  0x44   :  { %3049 = dma.done.wait [#allocation3], 32  }
  0x45   :  { %3050 = vsyncadd [#allocation3], 4294967264 }
  0x46   :  { %3051 = dma.done.wait [#allocation6], 2304  }
  0x47   :  { %3052 = vsyncadd [#allocation6], 4294964992 }
  0x48   :  { %3053 = dma.done.wait [#allocation9], 2048  }
  0x49   :  { %3054 = vsyncadd [#allocation9], 4294965248  ;;  %v3063_v0 = vmov 0.0|0.0   ;;  %vm3064_vm0 = vmmov 0   ;;  %v3065_v1 = vmov 0.0   ;;  %vm90_vm1 = vcmask 130048  }
  0x4a   :  { %2598 = vmatprep.subr.bf16.mxu0 %v3063_v0  ;;  %2152 = vmatprep.mubr.msk.f32.mxu0 %vm3064_vm0, %v3065_v1  ;;  %v81_v2 = vld [vmem:[#allocation5] sm:$0xff]  ;;  %v82_v3 = vld [vmem:[#allocation5 + $0x8] sm:$0xff]  ;;  %v80_v4 = vld [vmem:[#allocation2] sm:$0x3]  ;;  %s3066_s27 = smov [#allocation10]  }
  0x4b   :  { %2589 = vmatprep.subr.bf16.mxu1 %v3063_v0  ;;  %2131 = vmatprep.mubr.msk.f32.mxu1 %vm3064_vm0, %v3065_v1  ;;  %v95_v5 = vand.u32 4294901760, %v81_v2  ;;  %v98_v6 = vand.u32 4294901760, %v82_v3  ;;  %v92_v7 = vsel %vm90_vm1, %v80_v4, 0  ;;  %v554_v8 = vld [vmem:[#allocation7] sm:$0xff]  ;;  %v555_v9 = vld [vmem:[#allocation7 + $0x8] sm:$0xff]  ;;  %v556_v10 = vld [vmem:[#allocation7 + $0x10] sm:$0xff] }
  0x4c   :  { %v161_v11 = vand.u32 4294901760, %v92_v7  ;;  %v578_v12 = vand.u32 4294901760, %v554_v8  ;;  %v581_v13 = vand.u32 4294901760, %v555_v9  ;;  %v557_v14 = vld [vmem:[#allocation7 + $0x18] sm:$0xff]  ;;  %v584_v18 = vand.u32 4294901760, %v556_v10  ;;  %v558_v19 = vld [vmem:[#allocation7 + $0x20] sm:$0xff] }
  0x4d   :  { %v2590_v15 = vpack.c.bf16 %v98_v6, %v95_v5  ;;  %v173_v16 = vsub.f32 %v81_v2, %v95_v5  ;;  %v180_v17 = vsub.f32 %v82_v3, %v98_v6  ;;  %v587_v23 = vand.u32 4294901760, %v557_v14  ;;  %v559_v24 = vld [vmem:[#allocation7 + $0x28] sm:$0xff]  ;;  %v560_v46 = vld [vmem:[#allocation7 + $0x30] sm:$0xff]  ;;  %v561_v47 = vld [vmem:[#allocation7 + $0x38] sm:$0xff]  ;;  %s1891_s28 = sshll.u32 %s3066_s27, 4  ;;  %s1892_s28 = int_to_ptr.vmem [resolvable:$true] %s1891_s28 }
  0x4e   :  { %v162_v20 = vsub.f32 %v92_v7, %v161_v11  ;;  %v3170_v21 = vsub.f32 %v554_v8, %v578_v12  ;;  %v3172_v22 = vsub.f32 %v555_v9, %v581_v13  ;;  %v3176_v28 = vsub.f32 %v556_v10, %v584_v18  ;;  %v562_v51 = vld [vmem:[#allocation7 + $0x40] sm:$0xff]  ;;  %v563_v52 = vld [vmem:[#allocation7 + $0x48] sm:$0xff]  ;;  %v564_v58 = vld [vmem:[#allocation7 + $0x50] sm:$0xff]  ;;  %s3027_s29 = scalar_lea.vmem %s1892_s28, 32  ;;  %p3032_p5 = scmp.lt.s32.totalorder %s1892_s28, %s1892_s28 }
  0x4f   :  { %2600 = vmatpush3.bf16.msra.mxu0 %v2590_v15  ;;  %2591 = vmatpush3.bf16.msra.mxu1 %v2590_v15  ;;  %v174_v25 = vand.u32 4294901760, %v173_v16  ;;  %v181_v26 = vand.u32 4294901760, %v180_v17  ;;  %v3178_v29 = vsub.f32 %v557_v14, %v587_v23  ;;  %v590_v30 = vand.u32 4294901760, %v558_v19  ;;  %v565_v59 = vld [vmem:[#allocation7 + $0x58] sm:$0xff]  ;;  %v566_v63 = vld [vmem:[#allocation7 + $0x60] sm:$0xff]  ;;  %v567_v2 = vld [vmem:[#allocation7 + $0x68] sm:$0xff]  ;;  %p3028_p4 = scmp.ne.s32.totalorder %s1892_s28, %s3027_s29  ;;  %p3033_p6 = scmp.lt.s32.totalorder %s3027_s29, %s3027_s29 }
  0x50   :  { %v163_v27 = vand.u32 4294901760, %v162_v20  ;;  %2592 = vmatprep.subr.bf16.mxu1 %v3063_v0  ;;  %2601 = vmatprep.subr.bf16.mxu0 %v3063_v0  ;;  %v593_v34 = vand.u32 4294901760, %v559_v24  ;;  %v2596_v42 = vpack.c.bf16 %v180_v17, %v173_v16  ;;  %v3196_v43 = vpack.c.bf16 %v581_v13, %v578_v12  ;;  %v568_v6 = vld [vmem:[#allocation7 + $0x70] sm:$0xff]  ;;  %v569_v7 = vld [vmem:[#allocation7 + $0x78] sm:$0xff] }
  0x51   :  { %v175_v31 = vsub.f32 %v173_v16, %v174_v25  ;;  %v182_v32 = vsub.f32 %v180_v17, %v181_v26  ;;  %v2602_v33 = vpack.c.bf16 %v181_v26, %v174_v25  ;;  %v3180_v36 = vsub.f32 %v558_v19, %v590_v30  ;;  %p3034_p7 = por %p3033_p6, %p3032_p5 }
  0x52   :  { %2153 = vmatmul.mubr.f32.vlgmr.msra.gmra.mrb[0].mxu0 %v163_v27  ;;  %v164_v35 = vsub.f32 %v162_v20, %v163_v27  ;;  %v3184_v39 = vsub.f32 %v559_v24, %v593_v34  ;;  %v3201_v44 = vpack.c.bf16 %v587_v23, %v584_v18  ;;  %v3207_v45 = vpack.c.bf16 %v593_v34, %v590_v30 }
  0x53   :  { %v176_v37 = vand.u32 4294901760, %v175_v31  ;;  %v183_v38 = vand.u32 4294901760, %v182_v32  ;;  %2603 = vmatpush3.bf16.msra.mxu0 %v2602_v33  ;;  %2159 = vmatprep.mubr.msk.f32.mxu0 %vm3064_vm0, %v3065_v1  ;;  %v596_v48 = vand.u32 4294901760, %v560_v46  ;;  %v599_v49 = vand.u32 4294901760, %v561_v47  ;;  %p3035_p8 = pnand %p3034_p7, %p3028_p4 }
  0x54   :  { %v165_v40 = vand.u32 4294901760, %v164_v35  ;;  %2604 = vmatprep.subr.bf16.mxu0 %v3063_v0  ;;  %v602_v55 = vand.u32 4294901760, %v562_v51  ;;  %v605_v56 = vand.u32 4294901760, %v563_v52  ;;  %v608_v60 = vand.u32 4294901760, %v564_v58 }
  0x55   :  { %v2593_v41 = vpack.c.bf16 %v183_v38, %v176_v37  ;;  %v3212_v50 = vpack.c.bf16 %v599_v49, %v596_v48  ;;  %v3215_v53 = vsub.f32 %v560_v46, %v596_v48  ;;  %v3217_v54 = vsub.f32 %v561_v47, %v599_v49 }
  0x56   :  { %2132 = vmatmul.mubr.f32.vlgmr.msra.gmra.mrb[0].mxu1 %v165_v40  ;;  %v3220_v57 = vpack.c.bf16 %v605_v56, %v602_v55  ;;  %v611_v61 = vand.u32 4294901760, %v565_v59  ;;  %v614_v3 = vand.u32 4294901760, %v566_v63  ;;  %v617_v4 = vand.u32 4294901760, %v567_v2 }
  0x57   :  { %2594 = vmatpush3.bf16.msra.mxu1 %v2593_v41  ;;  %2138 = vmatprep.mubr.msk.f32.mxu1 %vm3064_vm0, %v3065_v1  ;;  %v620_v8 = vand.u32 4294901760, %v568_v6  ;;  %v623_v9 = vand.u32 4294901760, %v569_v7  ;;  %v671_v10 = vand.u32 4294901760, %v3170_v21  ;;  %v3234_v12 = vsub.f32 %v562_v51, %v602_v55 }
  0x58   :  { %2595 = vmatprep.subr.bf16.mxu1 %v3063_v0  ;;  %v3224_v62 = vpack.c.bf16 %v611_v61, %v608_v60  ;;  %v3228_v5 = vpack.c.bf16 %v617_v4, %v614_v3  ;;  %v3236_v13 = vsub.f32 %v563_v52, %v605_v56  ;;  %v3238_v14 = vsub.f32 %v564_v58, %v608_v60 }
  0x59   :  { %v3242_v16 = vsub.f32 %v566_v63, %v614_v3  ;;  %v3244_v17 = vsub.f32 %v567_v2, %v617_v4  ;;  %v3246_v18 = vpack.c.bf16 %v623_v9, %v620_v8  ;;  %v3248_v19 = vsub.f32 %v568_v6, %v620_v8 }
  0x5a   :  { %2160 = vmatmul.mubr.f32.vlgmr.msra.gmra.mrb[0].mxu0 %v161_v11  ;;  %v672_v23 = vsub.f32 %v3170_v21, %v671_v10  ;;  %v685_v25 = vand.u32 4294901760, %v3176_v28  ;;  %v692_v26 = vand.u32 4294901760, %v3178_v29  ;;  %v3761_v37 = vand.u32 4294901760, %v3180_v36 }
  0x5b   :  { %2606 = vmatpush3.bf16.msra.mxu0 %v2590_v15  ;;  %2166 = vmatprep.mubr.msk.f32.mxu0 %vm3064_vm0, %v3065_v1  ;;  %v3240_v15 = vsub.f32 %v565_v59, %v611_v61  ;;  %v3760_v38 = vand.u32 4294901760, %v3184_v39  ;;  %v3759_v48 = vand.u32 4294901760, %v3215_v53  ;;  %v3758_v49 = vand.u32 4294901760, %v3217_v54 }
  0x5c   :  { %2751 = vmatprep.subr.bf16.mxu0 %v3063_v0  ;;  %v673_v27 = vand.u32 4294901760, %v672_v23  ;;  %v686_v31 = vsub.f32 %v3176_v28, %v685_v25  ;;  %v693_v32 = vsub.f32 %v3178_v29, %v692_v26  ;;  %v700_v41 = vsub.f32 %v3180_v36, %v3761_v37 }
  0x5d   :  { %v714_v52 = vsub.f32 %v3215_v53, %v3759_v48  ;;  %v721_v55 = vsub.f32 %v3217_v54, %v3758_v49  ;;  %v3757_v59 = vand.u32 4294901760, %v3234_v12  ;;  %v3756_v60 = vand.u32 4294901760, %v3236_v13 }
  0x5e   :  { %2139 = vmatmul.mubr.f32.vlgmr.msra.gmra.mrb[0].mxu1 %v161_v11  ;;  %v687_v34 = vand.u32 4294901760, %v686_v31  ;;  %v694_v35 = vand.u32 4294901760, %v693_v32  ;;  %v701_v46 = vand.u32 4294901760, %v700_v41  ;;  %v3755_v6 = vand.u32 4294901760, %v3238_v14 }
  0x5f   :  { %2597 = vmatpush3.bf16.msra.mxu1 %v2596_v42  ;;  %2145 = vmatprep.mubr.msk.f32.mxu1 %vm3064_vm0, %v3065_v1  ;;  %v707_v42 = vsub.f32 %v3184_v39, %v3760_v38  ;;  %v715_v56 = vand.u32 4294901760, %v714_v52  ;;  %v722_v58 = vand.u32 4294901760, %v721_v55  ;;  %v728_v63 = vsub.f32 %v3234_v12, %v3757_v59  ;;  %v1228_v59 = vld [vmem:[#allocation8 + $0x48] sm:$0xff] }
  0x60   :  { %2607 = vmatprep.subr.bf16.mxu1 %v3063_v0  ;;  %v3272_v40 = vpack.c.bf16 %v694_v35, %v687_v34  ;;  %v735_v2 = vsub.f32 %v3236_v13, %v3756_v60  ;;  %v3752_v31 = vand.u32 4294901760, %v3244_v17 }
  0x61   :  { %v708_v47 = vand.u32 4294901760, %v707_v42  ;;  %v2641_v61 = vpack.c.bf16 %v722_v58, %v715_v56  ;;  %v729_v3 = vand.u32 4294901760, %v728_v63 }
  0x62   :  { %2167 = vmatmul.mubr.f32.vlgmr.msra.gmra.mrb[0].mxu0 %v161_v11  ;;  %v678_v11 = vand.u32 4294901760, %v3172_v22  ;;  %v736_v4 = vand.u32 4294901760, %v735_v2  ;;  %v763_v35 = vsub.f32 %v3244_v17, %v3752_v31 }
  0x63   :  { %2411 = vmatprep.mubr.msk.f32.mxu0 %vm3064_vm0, %v3065_v1  ;;  %v2638_v51 = vpack.c.bf16 %v708_v47, %v701_v46  ;;  %v3751_v46 = vand.u32 4294901760, %v3248_v19 }
  0x64   :  { %v679_v24 = vsub.f32 %v3172_v22, %v678_v11  ;;  %v2644_v8 = vpack.c.bf16 %v736_v4, %v729_v3  ;;  %v764_v42 = vand.u32 4294901760, %v763_v35  ;;  %v2656_v3 = vpack.c.bf16 %v3172_v22, %v3170_v21 }
  0x65   :  { %v770_v55 = vsub.f32 %v3248_v19, %v3751_v46  ;;  %v2659_v4 = vpack.c.bf16 %v3178_v29, %v3176_v28  ;;  %v3766_v21 = vand.u32 4294901760, %v3180_v36  ;;  %v3767_v22 = vand.u32 4294901760, %v3184_v39 }
  0x66   :  { %2146 = vmatmul.mubr.f32.vlgmr.msra.gmra.mrb[0].mxu1 %v162_v20  ;;  %v3250_v20 = vsub.f32 %v569_v7, %v623_v9  ;;  %v680_v30 = vand.u32 4294901760, %v679_v24  ;;  %v3754_v7 = vand.u32 4294901760, %v3240_v15  ;;  %v742_v9 = vsub.f32 %v3238_v14, %v3755_v6 }
  0x67   :  { %2609 = vmatpush3.bf16.msra.mxu1 %v3196_v43  ;;  %2201 = vmatprep.mubr.msk.f32.mxu1 %vm3064_vm0, %v3065_v1  ;;  %v771_v58 = vand.u32 4294901760, %v770_v55  ;;  %v1902_v55 = vld [vmem:[%s3744_s2] ss:$0 sm:$0xff]  ;;  %v3769_v28 = vand.u32 4294901760, %v3217_v54 }
  0x68   :  { %2610 = vmatprep.subr.bf16.mxu1 %v3063_v0  ;;  %v3268_v33 = vpack.c.bf16 %v680_v30, %v673_v27  ;;  %v749_v23 = vsub.f32 %v3240_v15, %v3754_v7  ;;  %v743_v24 = vand.u32 4294901760, %v742_v9  ;;  %v3753_v30 = vand.u32 4294901760, %v3242_v16 }
  0x69   :  { %v3750_v47 = vand.u32 4294901760, %v3250_v20  ;;  %v2662_v9 = vpack.c.bf16 %v3184_v39, %v3180_v36  ;;  %v2677_v35 = vpack.c.bf16 %v3250_v20, %v3248_v19  ;;  %v3772_v36 = vand.u32 4294901760, %v3238_v14 }
  0x6a   :  { %v750_v27 = vand.u32 4294901760, %v749_v23  ;;  %v756_v34 = vsub.f32 %v3242_v16, %v3753_v30  ;;  %v2665_v23 = vpack.c.bf16 %v3217_v54, %v3215_v53  ;;  %v3773_v39 = vand.u32 4294901760, %v3240_v15 }
  0x6b   :  { %2612 = vmatpush3.bf16.msra.mxu1 %v3201_v44  ;;  %v777_v56 = vsub.f32 %v3250_v20, %v3750_v47  ;;  %v3775_v54 = vand.u32 4294901760, %v3244_v17 }
  0x6c   :  { %2613 = vmatprep.subr.bf16.mxu1 %v3063_v0  ;;  %v2647_v32 = vpack.c.bf16 %v750_v27, %v743_v24  ;;  %v757_v41 = vand.u32 4294901760, %v756_v34  ;;  %v2668_v24 = vpack.c.bf16 %v3236_v13, %v3234_v12  ;;  %v2671_v27 = vpack.c.bf16 %v3240_v15, %v3238_v14  ;;  %v1232_v15 = vld [vmem:[#allocation8 + $0x68] sm:$0xff] }
  0x6d   :  { %v778_v63 = vand.u32 4294901760, %v777_v56  ;;  %v2674_v34 = vpack.c.bf16 %v3244_v17, %v3242_v16  ;;  %v1233_v17 = vld [vmem:[#allocation8 + $0x70] sm:$0xff] }
  0x6e   :  { %v2650_v52 = vpack.c.bf16 %v764_v42, %v757_v41 }
  0x6f   :  { %2615 = vmatpush3.bf16.msra.mxu1 %v3207_v45  ;;  %v2653_v2 = vpack.c.bf16 %v778_v63, %v771_v58 }
  0x70   :  { %2616 = vmatprep.subr.bf16.mxu1 %v3063_v0 }
  0x73   :  { %2618 = vmatpush3.bf16.msra.mxu1 %v3212_v50 }
  0x74   :  { %2619 = vmatprep.subr.bf16.mxu1 %v3063_v0 }
  0x77   :  { %2621 = vmatpush3.bf16.msra.mxu1 %v3220_v57 }
  0x78   :  { %2622 = vmatprep.subr.bf16.mxu1 %v3063_v0 }
  0x7b   :  { %2624 = vmatpush3.bf16.msra.mxu1 %v3224_v62 }
  0x7c   :  { %2625 = vmatprep.subr.bf16.mxu1 %v3063_v0 }
  0x7f   :  { %2627 = vmatpush3.bf16.msra.mxu1 %v3228_v5 }
  0x80   :  { %2628 = vmatprep.subr.bf16.mxu1 %v3063_v0 }
  0x83   :  { %2630 = vmatpush3.bf16.msra.mxu1 %v3246_v18 }
  0x84   :  { %2631 = vmatprep.subr.bf16.mxu1 %v3063_v0 }
 0x135   :  { %v549_v41 = vpop.f32.mrb[0].mxu0 }
 0x136   :  { %v2168_v42 = vpop.f32.mrb[1].mxu0 }
 0x139   :  { %v324_v56 = vpop.f32.mrb[0].mxu1 }
 0x13a   :  { %v2895_v58 = vadd.f32 %v1902_v55, %v324_v56  ;;  %v2147_v63 = vpop.f32.mrb[1].mxu1  ;;  %v1225_v55 = vld [vmem:[#allocation8 + $0x30] sm:$0xff]  ;;  %v1226_v56 = vld [vmem:[#allocation8 + $0x38] sm:$0xff] }
 0x13c   :  { %v2896_v47 = vadd.f32 %v2895_v58, %v549_v41  ;;  %v1227_v58 = vld [vmem:[#allocation8 + $0x40] sm:$0xff] }
 0x13e   :  { %v553_v46 = vmax.f32 %v2896_v47, 0.0  ;;  %v1224_v47 = vld [vmem:[#allocation8 + $0x28] sm:$0xff] }
 0x13f   :  { %v1258_v41 = vand.u32 4294901760, %v1224_v47 }
 0x140   :  { %v3339_v31 = vand.u32 4294901760, %v553_v46 }
 0x141   :  { %v3382_v37 = vsub.f32 %v1224_v47, %v1258_v41 }
 0x142   :  { %v3342_v30 = vsub.f32 %v553_v46, %v3339_v31  ;;  %v1223_v46 = vld [vmem:[#allocation8 + $0x20] sm:$0xff] }
 0x144   :  { %v660_v7 = vand.u32 4294901760, %v3342_v30 }
 0x146   :  { %v661_v42 = vsub.f32 %v3342_v30, %v660_v7 }
 0x148   :  { %v662_v6 = vand.u32 4294901760, %v661_v42 }
 0x14a   :  { %2202 = vmatmul.mubr.f32.vlgmr.msra.gmra.mrb[2].mxu1 %v662_v6 }
 0x14b   :  { %2633 = vmatpush3.bf16.msra.mxu1 %v3268_v33  ;;  %2236 = vmatprep.mubr.msk.f32.mxu1 %vm3064_vm0, %v3065_v1  ;;  %v1219_v33 = vld [vmem:[#allocation8] sm:$0xff] }
 0x14c   :  { %2634 = vmatprep.subr.bf16.mxu1 %v3063_v0 }
 0x14f   :  { %2636 = vmatpush3.bf16.msra.mxu1 %v3272_v40  ;;  %v1220_v40 = vld [vmem:[#allocation8 + $0x8] sm:$0xff] }
 0x150   :  { %2637 = vmatprep.subr.bf16.mxu1 %v3063_v0  ;;  %v1246_v6 = vand.u32 4294901760, %v1220_v40 }
 0x152   :  { %v3368_v42 = vsub.f32 %v1220_v40, %v1246_v6  ;;  %v1264_v40 = vand.u32 4294901760, %v1226_v56 }
 0x153   :  { %2639 = vmatpush3.bf16.msra.mxu1 %v2638_v51  ;;  %v1221_v51 = vld [vmem:[#allocation8 + $0x10] sm:$0xff] }
 0x154   :  { %2640 = vmatprep.subr.bf16.mxu1 %v3063_v0 }
 0x157   :  { %2642 = vmatpush3.bf16.msra.mxu1 %v2641_v61  ;;  %v1243_v61 = vand.u32 4294901760, %v1219_v33 }
 0x158   :  { %2643 = vmatprep.subr.bf16.mxu1 %v3063_v0 }
 0x159   :  { %v3364_v63 = vpack.c.bf16 %v1246_v6, %v1243_v61 }
 0x15b   :  { %2645 = vmatpush3.bf16.msra.mxu1 %v2644_v8  ;;  %v1222_v8 = vld [vmem:[#allocation8 + $0x18] sm:$0xff]  ;;  %2753 = vmatpush3.bf16.msra.mxu0 %v3364_v63 }
 0x15c   :  { %2646 = vmatprep.subr.bf16.mxu1 %v3063_v0  ;;  %2754 = vmatprep.subr.bf16.mxu0 %v3063_v0 }
 0x15f   :  { %2648 = vmatpush3.bf16.msra.mxu1 %v2647_v32  ;;  %v1249_v32 = vand.u32 4294901760, %v1221_v51 }
 0x160   :  { %2649 = vmatprep.subr.bf16.mxu1 %v3063_v0 }
 0x161   :  { %v3370_v60 = vsub.f32 %v1221_v51, %v1249_v32  ;;  %v1270_v51 = vand.u32 4294901760, %v1228_v59 }
 0x163   :  { %2651 = vmatpush3.bf16.msra.mxu1 %v2650_v52  ;;  %v1252_v52 = vand.u32 4294901760, %v1222_v8 }
 0x164   :  { %2652 = vmatprep.subr.bf16.mxu1 %v3063_v0 }
 0x165   :  { %v3372_v49 = vpack.c.bf16 %v1252_v52, %v1249_v32  ;;  %v3374_v48 = vsub.f32 %v1222_v8, %v1252_v52  ;;  %v3388_v8 = vsub.f32 %v1226_v56, %v1264_v40 }
 0x167   :  { %2654 = vmatpush3.bf16.msra.mxu1 %v2653_v2  ;;  %v1255_v2 = vand.u32 4294901760, %v1223_v46  ;;  %2756 = vmatpush3.bf16.msra.mxu0 %v3372_v49 }
 0x168   :  { %2655 = vmatprep.subr.bf16.mxu1 %v3063_v0  ;;  %2757 = vmatprep.subr.bf16.mxu0 %v3063_v0 }
 0x169   :  { %v3376_v38 = vsub.f32 %v1223_v46, %v1255_v2  ;;  %v3392_v46 = vsub.f32 %v1228_v59, %v1270_v51 }
 0x16a   :  { %2237 = vmatmul.mubr.f32.vlgmr.msra.gmra.mrb[2].mxu1 %v3339_v31 }
 0x16b   :  { %2657 = vmatpush3.bf16.msra.mxu1 %v2656_v3  ;;  %2271 = vmatprep.mubr.msk.f32.mxu1 %vm3064_vm0, %v3065_v1  ;;  %v3366_v3 = vsub.f32 %v1219_v33, %v1243_v61  ;;  %v1261_v33 = vand.u32 4294901760, %v1225_v55  ;;  %v1267_v61 = vand.u32 4294901760, %v1227_v58 }
 0x16c   :  { %2658 = vmatprep.subr.bf16.mxu1 %v3063_v0 }
 0x16d   :  { %v3386_v6 = vsub.f32 %v1225_v55, %v1261_v33  ;;  %v3390_v32 = vsub.f32 %v1227_v58, %v1267_v61  ;;  %v3406_v59 = vpack.c.bf16 %v1264_v40, %v1261_v33 }
 0x16f   :  { %2660 = vmatpush3.bf16.msra.mxu1 %v2659_v4  ;;  %v3398_v4 = vpack.c.bf16 %v1258_v41, %v1255_v2 }
 0x170   :  { %2661 = vmatprep.subr.bf16.mxu1 %v3063_v0 }
 0x171   :  { %2759 = vmatpush3.bf16.msra.mxu0 %v3398_v4 }
 0x172   :  { %2760 = vmatprep.subr.bf16.mxu0 %v3063_v0 }
 0x173   :  { %2663 = vmatpush3.bf16.msra.mxu1 %v2662_v9  ;;  %v3414_v9 = vpack.c.bf16 %v1270_v51, %v1267_v61 }
 0x174   :  { %2664 = vmatprep.subr.bf16.mxu1 %v3063_v0 }
 0x175   :  { %2762 = vmatpush3.bf16.msra.mxu0 %v3406_v59 }
 0x176   :  { %2763 = vmatprep.subr.bf16.mxu0 %v3063_v0 }
 0x177   :  { %2666 = vmatpush3.bf16.msra.mxu1 %v2665_v23  ;;  %v2704_v23 = vpack.c.bf16 %v678_v11, %v671_v10  ;;  %v2710_v10 = vpack.c.bf16 %v3767_v22, %v3766_v21  ;;  %v3768_v11 = vand.u32 4294901760, %v3215_v53  ;;  %v3774_v53 = vand.u32 4294901760, %v3242_v16 }
 0x178   :  { %2667 = vmatprep.subr.bf16.mxu1 %v3063_v0  ;;  %v1282_v16 = vand.u32 4294901760, %v1232_v15 }
 0x179   :  { %2765 = vmatpush3.bf16.msra.mxu0 %v3414_v9  ;;  %v2713_v29 = vpack.c.bf16 %v3769_v28, %v3768_v11  ;;  %v1364_v11 = vand.u32 4294901760, %v3376_v38  ;;  %v1371_v28 = vand.u32 4294901760, %v3382_v37 }
 0x17a   :  { %2766 = vmatprep.subr.bf16.mxu0 %v3063_v0  ;;  %v3538_v58 = vsub.f32 %v1232_v15, %v1282_v16 }
 0x17b   :  { %2669 = vmatpush3.bf16.msra.mxu1 %v2668_v24  ;;  %v2707_v24 = vpack.c.bf16 %v692_v26, %v685_v25  ;;  %v3770_v25 = vand.u32 4294901760, %v3234_v12  ;;  %v3771_v26 = vand.u32 4294901760, %v3236_v13  ;;  %v3776_v12 = vand.u32 4294901760, %v3248_v19 }
 0x17c   :  { %2670 = vmatprep.subr.bf16.mxu1 %v3063_v0  ;;  %v3777_v13 = vand.u32 4294901760, %v3250_v20  ;;  %v1285_v19 = vand.u32 4294901760, %v1233_v17 }
 0x17e   :  { %v3541_v33 = vsub.f32 %v1233_v17, %v1285_v19 }
 0x17f   :  { %2672 = vmatpush3.bf16.msra.mxu1 %v2671_v27  ;;  %v2722_v27 = vpack.c.bf16 %v3775_v54, %v3774_v53  ;;  %v1378_v53 = vand.u32 4294901760, %v3386_v6  ;;  %v1385_v54 = vand.u32 4294901760, %v3388_v8 }
 0x180   :  { %2673 = vmatprep.subr.bf16.mxu1 %v3063_v0 }
 0x183   :  { %2675 = vmatpush3.bf16.msra.mxu1 %v2674_v34  ;;  %v2725_v34 = vpack.c.bf16 %v3777_v13, %v3776_v12  ;;  %v1379_v12 = vsub.f32 %v3386_v6, %v1378_v53  ;;  %v1386_v13 = vsub.f32 %v3388_v8, %v1385_v54 }
 0x184   :  { %2676 = vmatprep.subr.bf16.mxu1 %v3063_v0 }
 0x187   :  { %2678 = vmatpush3.bf16.msra.mxu1 %v2677_v35  ;;  %v1343_v35 = vand.u32 4294901760, %v3368_v42 }
 0x188   :  { %2679 = vmatprep.subr.bf16.mxu1 %v3063_v0 }
 0x189   :  { %v1344_v2 = vsub.f32 %v3368_v42, %v1343_v35 }
 0x18a   :  { %2272 = vmatmul.mubr.f32.vlgmr.msra.gmra.mrb[2].mxu1 %v3342_v30  ;;  %v2719_v30 = vpack.c.bf16 %v3773_v39, %v3772_v36 }
 0x18b   :  { %2681 = vmatpush3.bf16.msra.mxu1 %v3196_v43  ;;  %2306 = vmatprep.mubr.msk.f32.mxu1 %vm3064_vm0, %v3065_v1  ;;  %v1345_v51 = vand.u32 4294901760, %v1344_v2 }
 0x18c   :  { %2682 = vmatprep.subr.bf16.mxu1 %v3063_v0 }
 0x18f   :  { %2684 = vmatpush3.bf16.msra.mxu1 %v3201_v44 }
 0x190   :  { %2685 = vmatprep.subr.bf16.mxu1 %v3063_v0 }
 0x193   :  { %2687 = vmatpush3.bf16.msra.mxu1 %v3207_v45 }
 0x194   :  { %2688 = vmatprep.subr.bf16.mxu1 %v3063_v0 }
 0x197   :  { %2690 = vmatpush3.bf16.msra.mxu1 %v3212_v50 }
 0x198   :  { %2691 = vmatprep.subr.bf16.mxu1 %v3063_v0 }
 0x19b   :  { %2693 = vmatpush3.bf16.msra.mxu1 %v3220_v57 }
 0x19c   :  { %2694 = vmatprep.subr.bf16.mxu1 %v3063_v0 }
 0x19f   :  { %2696 = vmatpush3.bf16.msra.mxu1 %v3224_v62 }
 0x1a0   :  { %2697 = vmatprep.subr.bf16.mxu1 %v3063_v0 }
 0x1a3   :  { %2699 = vmatpush3.bf16.msra.mxu1 %v3228_v5 }
 0x1a4   :  { %2700 = vmatprep.subr.bf16.mxu1 %v3063_v0 }
 0x1a7   :  { %2702 = vmatpush3.bf16.msra.mxu1 %v3246_v18 }
 0x1a8   :  { %2703 = vmatprep.subr.bf16.mxu1 %v3063_v0 }
 0x1aa   :  { %2307 = vmatmul.mubr.f32.vlgmr.msra.gmra.mrb[2].mxu1 %v660_v7  ;;  %v2716_v7 = vpack.c.bf16 %v3771_v26, %v3770_v25  ;;  %v1365_v26 = vsub.f32 %v3376_v38, %v1364_v11 }
 0x1ab   :  { %2705 = vmatpush3.bf16.msra.mxu1 %v2704_v23  ;;  %2341 = vmatprep.mubr.msk.f32.mxu1 %vm3064_vm0, %v3065_v1  ;;  %v1350_v23 = vand.u32 4294901760, %v3370_v60 }
 0x1ac   :  { %2706 = vmatprep.subr.bf16.mxu1 %v3063_v0  ;;  %v1366_v39 = vand.u32 4294901760, %v1365_v26 }
 0x1ad   :  { %v1351_v22 = vsub.f32 %v3370_v60, %v1350_v23 }
 0x1af   :  { %2708 = vmatpush3.bf16.msra.mxu1 %v2707_v24  ;;  %v1357_v24 = vand.u32 4294901760, %v3374_v48 }
 0x1b0   :  { %2709 = vmatprep.subr.bf16.mxu1 %v3063_v0 }
 0x1b3   :  { %2711 = vmatpush3.bf16.msra.mxu1 %v2710_v10  ;;  %v1358_v10 = vsub.f32 %v3374_v48, %v1357_v24 }
 0x1b4   :  { %2712 = vmatprep.subr.bf16.mxu1 %v3063_v0 }
 0x1b5   :  { %v1359_v25 = vand.u32 4294901760, %v1358_v10 }
 0x1b7   :  { %2714 = vmatpush3.bf16.msra.mxu1 %v2713_v29  ;;  %v1352_v29 = vand.u32 4294901760, %v1351_v22  ;;  %v3764_v22 = vand.u32 4294901760, %v3538_v58 }
 0x1b8   :  { %2715 = vmatprep.subr.bf16.mxu1 %v3063_v0 }
 0x1b9   :  { %v2779_v36 = vpack.c.bf16 %v1359_v25, %v1352_v29  ;;  %v1428_v25 = vsub.f32 %v3538_v58, %v3764_v22 }
 0x1bb   :  { %2717 = vmatpush3.bf16.msra.mxu1 %v2716_v7  ;;  %v1372_v7 = vsub.f32 %v3382_v37, %v1371_v28 }
 0x1bc   :  { %2718 = vmatprep.subr.bf16.mxu1 %v3063_v0 }
 0x1bf   :  { %2720 = vmatpush3.bf16.msra.mxu1 %v2719_v30  ;;  %v1373_v30 = vand.u32 4294901760, %v1372_v7  ;;  %v1429_v7 = vand.u32 4294901760, %v1428_v25 }
 0x1c0   :  { %2721 = vmatprep.subr.bf16.mxu1 %v3063_v0 }
 0x1c3   :  { %2723 = vmatpush3.bf16.msra.mxu1 %v2722_v27  ;;  %v2782_v27 = vpack.c.bf16 %v1373_v30, %v1366_v39  ;;  %v3763_v39 = vand.u32 4294901760, %v3541_v33 }
 0x1c4   :  { %2724 = vmatprep.subr.bf16.mxu1 %v3063_v0 }
 0x1c7   :  { %2726 = vmatpush3.bf16.msra.mxu1 %v2725_v34  ;;  %v1380_v34 = vand.u32 4294901760, %v1379_v12 }
 0x1c8   :  { %2727 = vmatprep.subr.bf16.mxu1 %v3063_v0 }
 0x1ca   :  { %2342 = vmatmul.mubr.f32.vlgmr.msra.gmra.mrb[2].mxu1 %v3339_v31 }
 0x1cb   :  { %2729 = vmatpush3.bf16.msra.mxu1 %v3196_v43  ;;  %2376 = vmatprep.mubr.msk.f32.mxu1 %vm3064_vm0, %v3065_v1  ;;  %v1229_v43 = vld [vmem:[#allocation8 + $0x50] sm:$0xff] }
 0x1cc   :  { %2730 = vmatprep.subr.bf16.mxu1 %v3063_v0 }
 0x1cf   :  { %2732 = vmatpush3.bf16.msra.mxu1 %v3201_v44  ;;  %v1230_v44 = vld [vmem:[#allocation8 + $0x58] sm:$0xff] }
 0x1d0   :  { %2733 = vmatprep.subr.bf16.mxu1 %v3063_v0 }
 0x1d3   :  { %2735 = vmatpush3.bf16.msra.mxu1 %v3207_v45  ;;  %v1273_v45 = vand.u32 4294901760, %v1229_v43 }
 0x1d4   :  { %2736 = vmatprep.subr.bf16.mxu1 %v3063_v0 }
 0x1d5   :  { %v3532_v41 = vsub.f32 %v1229_v43, %v1273_v45  ;;  %v1387_v43 = vand.u32 4294901760, %v1386_v13  ;;  %v1435_v13 = vsub.f32 %v3541_v33, %v3763_v39 }
 0x1d7   :  { %2738 = vmatpush3.bf16.msra.mxu1 %v3212_v50  ;;  %v1276_v50 = vand.u32 4294901760, %v1230_v44  ;;  %v1406_v17 = vand.u32 4294901760, %v3532_v41 }
 0x1d8   :  { %2739 = vmatprep.subr.bf16.mxu1 %v3063_v0 }
 0x1d9   :  { %v3514_v14 = vpack.c.bf16 %v1276_v50, %v1273_v45  ;;  %v3534_v55 = vsub.f32 %v1230_v44, %v1276_v50  ;;  %v1392_v44 = vand.u32 4294901760, %v3390_v32  ;;  %v1399_v45 = vand.u32 4294901760, %v3392_v46 }
 0x1da   :  { %v2785_v50 = vpack.c.bf16 %v1387_v43, %v1380_v34  ;;  %v1436_v43 = vand.u32 4294901760, %v1435_v13 }
 0x1db   :  { %2741 = vmatpush3.bf16.msra.mxu1 %v3220_v57  ;;  %v1231_v57 = vld [vmem:[#allocation8 + $0x60] sm:$0xff]  ;;  %2768 = vmatpush3.bf16.msra.mxu0 %v3514_v14  ;;  %v1400_v15 = vsub.f32 %v3392_v46, %v1399_v45 }
 0x1dc   :  { %2742 = vmatprep.subr.bf16.mxu1 %v3063_v0  ;;  %2769 = vmatprep.subr.bf16.mxu0 %v3063_v0 }
 0x1df   :  { %2744 = vmatpush3.bf16.msra.mxu1 %v3224_v62  ;;  %v1279_v62 = vand.u32 4294901760, %v1231_v57 }
 0x1e0   :  { %2745 = vmatprep.subr.bf16.mxu1 %v3063_v0 }
 0x1e1   :  { %v3536_v56 = vsub.f32 %v1231_v57, %v1279_v62  ;;  %v1393_v57 = vsub.f32 %v3390_v32, %v1392_v44 }
 0x1e3   :  { %2747 = vmatpush3.bf16.msra.mxu1 %v3228_v5  ;;  %v3518_v5 = vpack.c.bf16 %v1282_v16, %v1279_v62  ;;  %v1394_v62 = vand.u32 4294901760, %v1393_v57  ;;  %v1401_v16 = vand.u32 4294901760, %v1400_v15 }
 0x1e4   :  { %2748 = vmatprep.subr.bf16.mxu1 %v3063_v0 }
 0x1e5   :  { %2771 = vmatpush3.bf16.msra.mxu0 %v3518_v5 }
 0x1e6   :  { %2772 = vmatprep.subr.bf16.mxu0 %v3063_v0 }
 0x1e7   :  { %2750 = vmatpush3.bf16.msra.mxu1 %v3246_v18  ;;  %v1234_v18 = vld [vmem:[#allocation8 + $0x78] sm:$0xff] }
 0x1e8   :  { %v1288_v20 = vand.u32 4294901760, %v1234_v18 }
 0x1ea   :  { %2377 = vmatmul.mubr.f32.vlgmr.msra.gmra.mrb[2].mxu1 %v3339_v31  ;;  %v1336_v31 = vand.u32 4294901760, %v3366_v3  ;;  %v3524_v47 = vpack.c.bf16 %v1288_v20, %v1285_v19  ;;  %v3543_v40 = vsub.f32 %v1234_v18, %v1288_v20  ;;  %v1413_v18 = vand.u32 4294901760, %v3534_v55 }
 0x1eb   :  { %v2788_v19 = vpack.c.bf16 %v1401_v16, %v1394_v62  ;;  %v1407_v20 = vsub.f32 %v3532_v41, %v1406_v17  ;;  %v2800_v62 = vpack.c.bf16 %v3368_v42, %v3366_v3  ;;  %v2803_v16 = vpack.c.bf16 %v3374_v48, %v3370_v60 }
 0x1ec   :  { %v1337_v52 = vsub.f32 %v3366_v3, %v1336_v31  ;;  %2774 = vmatpush3.bf16.msra.mxu0 %v3524_v47  ;;  %v3762_v30 = vand.u32 4294901760, %v3543_v40  ;;  %v2821_v25 = vpack.c.bf16 %v3543_v40, %v3541_v33  ;;  %v2854_v3 = vpack.c.bf16 %v1371_v28, %v1364_v11 }
 0x1ed   :  { %2775 = vmatprep.subr.bf16.mxu0 %v3063_v0  ;;  %v1408_v2 = vand.u32 4294901760, %v1407_v20  ;;  %v2806_v20 = vpack.c.bf16 %v3382_v37, %v3376_v38  ;;  %v2857_v48 = vpack.c.bf16 %v1385_v54, %v1378_v53  ;;  %v2860_v60 = vpack.c.bf16 %v1399_v45, %v1392_v44 }
 0x1ee   :  { %v1338_v61 = vand.u32 4294901760, %v1337_v52  ;;  %v1414_v52 = vsub.f32 %v3534_v55, %v1413_v18  ;;  %v1442_v34 = vsub.f32 %v3543_v40, %v3762_v30  ;;  %v2863_v37 = vpack.c.bf16 %v1413_v18, %v1406_v17 }
 0x1ef   :  { %v3778_v38 = vand.u32 4294901760, %v3536_v56  ;;  %v3779_v42 = vand.u32 4294901760, %v3538_v58 }
 0x1f0   :  { %v3548_v21 = vpack.c.bf16 %v1345_v51, %v1338_v61  ;;  %v1415_v61 = vand.u32 4294901760, %v1414_v52  ;;  %v3765_v51 = vand.u32 4294901760, %v3536_v56  ;;  %v1443_v57 = vand.u32 4294901760, %v1442_v34 }
 0x1f1   :  { %v2809_v52 = vpack.c.bf16 %v3388_v8, %v3386_v6  ;;  %v2866_v6 = vpack.c.bf16 %v3779_v42, %v3778_v38  ;;  %v3780_v8 = vand.u32 4294901760, %v3541_v33 }
 0x1f2   :  { %v2791_v10 = vpack.c.bf16 %v1415_v61, %v1408_v2  ;;  %v1421_v29 = vsub.f32 %v3536_v56, %v3765_v51  ;;  %v2797_v15 = vpack.c.bf16 %v1443_v57, %v1436_v43  ;;  %v2812_v2 = vpack.c.bf16 %v3392_v46, %v3390_v32 }
 0x1f3   :  { %v2815_v61 = vpack.c.bf16 %v3534_v55, %v3532_v41  ;;  %v3781_v32 = vand.u32 4294901760, %v3543_v40 }
 0x1f4   :  { %v1422_v26 = vand.u32 4294901760, %v1421_v29  ;;  %v2818_v29 = vpack.c.bf16 %v3538_v58, %v3536_v56 }
 0x1f5   :  { %v2869_v46 = vpack.c.bf16 %v3781_v32, %v3780_v8 }
 0x1f6   :  { %v2794_v12 = vpack.c.bf16 %v1429_v7, %v1422_v26  ;;  %v1903_v26 = vld [vmem:[%s3746_s4] ss:$0 sm:$0xff] }
 0x2bd   :  { %v1214_v7 = vpop.f32.mrb[2].mxu1 }
 0x2be   :  { %v2897_v13 = vadd.f32 %v1903_v26, %v1214_v7  ;;  %v2378_v34 = vpop.f32.mrb[3].mxu1 }
 0x2c0   :  { %v1218_v43 = vmax.f32 %v2897_v13, 0.0 }
 0x2c2   :  { %v3623_v57 = vand.u32 4294901760, %v1218_v43 }
 0x2c4   :  { %v1324_v30 = vsub.f32 %v1218_v43, %v3623_v57 }
 0x2c6   :  { %v1325_v39 = vand.u32 4294901760, %v1324_v30 }
 0x2c8   :  { %v1326_v22 = vsub.f32 %v1324_v30, %v1325_v39 }
 0x2ca   :  { %v1327_v51 = vand.u32 4294901760, %v1326_v22 }
 0x2cc   :  { %2412 = vmatmul.mubr.f32.vlgmr.msra.gmra.mrb[2].mxu0 %v1327_v51 }
 0x2cd   :  { %2777 = vmatpush3.bf16.msra.mxu0 %v3548_v21  ;;  %2446 = vmatprep.mubr.msk.f32.mxu0 %vm3064_vm0, %v3065_v1  ;;  %v2848_v21 = vpack.c.bf16 %v1343_v35, %v1336_v31 }
 0x2ce   :  { %2778 = vmatprep.subr.bf16.mxu0 %v3063_v0 }
 0x2d1   :  { %2780 = vmatpush3.bf16.msra.mxu0 %v2779_v36  ;;  %v2851_v36 = vpack.c.bf16 %v1357_v24, %v1350_v23 }
 0x2d2   :  { %2781 = vmatprep.subr.bf16.mxu0 %v3063_v0 }
 0x2d5   :  { %2783 = vmatpush3.bf16.msra.mxu0 %v2782_v27 }
 0x2d6   :  { %2784 = vmatprep.subr.bf16.mxu0 %v3063_v0 }
 0x2d9   :  { %2786 = vmatpush3.bf16.msra.mxu0 %v2785_v50 }
 0x2da   :  { %2787 = vmatprep.subr.bf16.mxu0 %v3063_v0 }
 0x2dd   :  { %2789 = vmatpush3.bf16.msra.mxu0 %v2788_v19 }
 0x2de   :  { %2790 = vmatprep.subr.bf16.mxu0 %v3063_v0 }
 0x2e1   :  { %2792 = vmatpush3.bf16.msra.mxu0 %v2791_v10 }
 0x2e2   :  { %2793 = vmatprep.subr.bf16.mxu0 %v3063_v0 }
 0x2e5   :  { %2795 = vmatpush3.bf16.msra.mxu0 %v2794_v12 }
 0x2e6   :  { %2796 = vmatprep.subr.bf16.mxu0 %v3063_v0 }
 0x2e9   :  { %2798 = vmatpush3.bf16.msra.mxu0 %v2797_v15 }
 0x2ea   :  { %2799 = vmatprep.subr.bf16.mxu0 %v3063_v0 }
 0x2ec   :  { %2447 = vmatmul.mubr.f32.vlgmr.msra.gmra.mrb[2].mxu0 %v3623_v57 }
 0x2ed   :  { %2801 = vmatpush3.bf16.msra.mxu0 %v2800_v62  ;;  %2481 = vmatprep.mubr.msk.f32.mxu0 %vm3064_vm0, %v3065_v1 }
 0x2ee   :  { %2802 = vmatprep.subr.bf16.mxu0 %v3063_v0 }
 0x2f1   :  { %2804 = vmatpush3.bf16.msra.mxu0 %v2803_v16 }
 0x2f2   :  { %2805 = vmatprep.subr.bf16.mxu0 %v3063_v0 }
 0x2f5   :  { %2807 = vmatpush3.bf16.msra.mxu0 %v2806_v20 }
 0x2f6   :  { %2808 = vmatprep.subr.bf16.mxu0 %v3063_v0 }
 0x2f9   :  { %2810 = vmatpush3.bf16.msra.mxu0 %v2809_v52 }
 0x2fa   :  { %2811 = vmatprep.subr.bf16.mxu0 %v3063_v0 }
 0x2fd   :  { %2813 = vmatpush3.bf16.msra.mxu0 %v2812_v2 }
 0x2fe   :  { %2814 = vmatprep.subr.bf16.mxu0 %v3063_v0 }
 0x301   :  { %2816 = vmatpush3.bf16.msra.mxu0 %v2815_v61 }
 0x302   :  { %2817 = vmatprep.subr.bf16.mxu0 %v3063_v0 }
 0x305   :  { %2819 = vmatpush3.bf16.msra.mxu0 %v2818_v29 }
 0x306   :  { %2820 = vmatprep.subr.bf16.mxu0 %v3063_v0 }
 0x309   :  { %2822 = vmatpush3.bf16.msra.mxu0 %v2821_v25 }
 0x30a   :  { %2823 = vmatprep.subr.bf16.mxu0 %v3063_v0 }
 0x30c   :  { %2482 = vmatmul.mubr.f32.vlgmr.msra.gmra.mrb[2].mxu0 %v1324_v30 }
 0x30d   :  { %2825 = vmatpush3.bf16.msra.mxu0 %v3364_v63  ;;  %2516 = vmatprep.mubr.msk.f32.mxu0 %vm3064_vm0, %v3065_v1 }
 0x30e   :  { %2826 = vmatprep.subr.bf16.mxu0 %v3063_v0 }
 0x311   :  { %2828 = vmatpush3.bf16.msra.mxu0 %v3372_v49 }
 0x312   :  { %2829 = vmatprep.subr.bf16.mxu0 %v3063_v0 }
 0x315   :  { %2831 = vmatpush3.bf16.msra.mxu0 %v3398_v4 }
 0x316   :  { %2832 = vmatprep.subr.bf16.mxu0 %v3063_v0 }
 0x319   :  { %2834 = vmatpush3.bf16.msra.mxu0 %v3406_v59 }
 0x31a   :  { %2835 = vmatprep.subr.bf16.mxu0 %v3063_v0 }
 0x31d   :  { %2837 = vmatpush3.bf16.msra.mxu0 %v3414_v9 }
 0x31e   :  { %2838 = vmatprep.subr.bf16.mxu0 %v3063_v0 }
 0x321   :  { %2840 = vmatpush3.bf16.msra.mxu0 %v3514_v14 }
 0x322   :  { %2841 = vmatprep.subr.bf16.mxu0 %v3063_v0 }
 0x325   :  { %2843 = vmatpush3.bf16.msra.mxu0 %v3518_v5 }
 0x326   :  { %2844 = vmatprep.subr.bf16.mxu0 %v3063_v0 }
 0x329   :  { %2846 = vmatpush3.bf16.msra.mxu0 %v3524_v47 }
 0x32a   :  { %2847 = vmatprep.subr.bf16.mxu0 %v3063_v0 }
 0x32c   :  { %2517 = vmatmul.mubr.f32.vlgmr.msra.gmra.mrb[2].mxu0 %v1325_v39 }
 0x32d   :  { %2849 = vmatpush3.bf16.msra.mxu0 %v2848_v21  ;;  %2551 = vmatprep.mubr.msk.f32.mxu0 %vm3064_vm0, %v3065_v1 }
 0x32e   :  { %2850 = vmatprep.subr.bf16.mxu0 %v3063_v0 }
 0x331   :  { %2852 = vmatpush3.bf16.msra.mxu0 %v2851_v36 }
 0x332   :  { %2853 = vmatprep.subr.bf16.mxu0 %v3063_v0 }
 0x335   :  { %2855 = vmatpush3.bf16.msra.mxu0 %v2854_v3 }
 0x336   :  { %2856 = vmatprep.subr.bf16.mxu0 %v3063_v0 }
 0x339   :  { %2858 = vmatpush3.bf16.msra.mxu0 %v2857_v48 }
 0x33a   :  { %2859 = vmatprep.subr.bf16.mxu0 %v3063_v0 }
 0x33d   :  { %2861 = vmatpush3.bf16.msra.mxu0 %v2860_v60 }
 0x33e   :  { %2862 = vmatprep.subr.bf16.mxu0 %v3063_v0 }
 0x341   :  { %2864 = vmatpush3.bf16.msra.mxu0 %v2863_v37 }
 0x342   :  { %2865 = vmatprep.subr.bf16.mxu0 %v3063_v0 }
 0x345   :  { %2867 = vmatpush3.bf16.msra.mxu0 %v2866_v6 }
 0x346   :  { %2868 = vmatprep.subr.bf16.mxu0 %v3063_v0 }
 0x349   :  { %2870 = vmatpush3.bf16.msra.mxu0 %v2869_v46 }
 0x34a   :  { %2871 = vmatprep.subr.bf16.mxu0 %v3063_v0 }
 0x34c   :  { %2552 = vmatmul.mubr.f32.vlgmr.msra.gmra.mrb[2].mxu0 %v3623_v57 }
 0x34d   :  { %2873 = vmatpush3.bf16.msra.mxu0 %v3364_v63  ;;  %2586 = vmatprep.mubr.msk.f32.mxu0 %vm3064_vm0, %v3065_v1  ;;  %v1904_v1 = vld [vmem:[%s3748_s6] ss:$0 sm:$0xff] }
 0x34e   :  { %2874 = vmatprep.subr.bf16.mxu0 %v3063_v0 }
 0x351   :  { %2876 = vmatpush3.bf16.msra.mxu0 %v3372_v49 }
 0x352   :  { %2877 = vmatprep.subr.bf16.mxu0 %v3063_v0 }
 0x355   :  { %2879 = vmatpush3.bf16.msra.mxu0 %v3398_v4 }
 0x356   :  { %2880 = vmatprep.subr.bf16.mxu0 %v3063_v0 }
 0x359   :  { %2882 = vmatpush3.bf16.msra.mxu0 %v3406_v59 }
 0x35a   :  { %2883 = vmatprep.subr.bf16.mxu0 %v3063_v0 }
 0x35d   :  { %2885 = vmatpush3.bf16.msra.mxu0 %v3414_v9 }
 0x35e   :  { %2886 = vmatprep.subr.bf16.mxu0 %v3063_v0 }
 0x361   :  { %2888 = vmatpush3.bf16.msra.mxu0 %v3514_v14 }
 0x362   :  { %2889 = vmatprep.subr.bf16.mxu0 %v3063_v0 }
 0x365   :  { %2891 = vmatpush3.bf16.msra.mxu0 %v3518_v5 }
 0x366   :  { %2892 = vmatprep.subr.bf16.mxu0 %v3063_v0 }
 0x369   :  { %2894 = vmatpush3.bf16.msra.mxu0 %v3524_v47 }
 0x36c   :  { %2587 = vmatmul.mubr.f32.vlgmr.msra.gmra.mrb[2].mxu0 %v3623_v57 }
 0x43f   :  { %v1879_v49 = vpop.f32.mrb[2].mxu0 }
 0x440   :  { %v2898_v63 = vadd.f32 %v1904_v1, %v1879_v49  ;;  %v2588_v4 = vpop.f32.mrb[3].mxu0 }
 0x442   :  { %2937 = vtanh.f32 %v2898_v63 }
 0x44c   :  { %v2938_v59 = vpop.eup %2937 }
 0x44d   :  { %1884 = vst [vmem:[#allocation10] sm:$0x3] %v2938_v59 }
 0x44e   :  { %3038 = shalt.err (!%p3035_p8)
}
 0x44f   :  { %s3039_s6 = scalar_lea.hbm %s3749_s7, 32 }
 0x450   :  { %p3040_p9 = scmp.ne.s32.totalorder %s3749_s7, %s3039_s6  ;;  %p3043_p10 = scmp.lt.u32.totalorder %s3039_s6, %s3749_s7 }
 0x452   :  { %p3045_p11 = pnand %p3043_p10, %p3040_p9 }
 0x454   :  { %3048 = shalt.err (!%p3045_p11)
}
 0x455   :  { %1894 = dma.vmem_to_hbm [thread:$0]  %s1892_s28, 32, %s3749_s7, [#allocation4]  }
 0x456   :  { %3055 = dma.done.wait [#allocation4], 32  }
 0x457   :  { %3056 = vsyncadd [#allocation4], 4294967264 }
 0x458   :  { %1898 = vsyncpa [#allocation3], 1 }
 0x459   :  { %1899 = vsyncpa [#allocation6], 1 }
 0x45a   :  { %1900 = vsyncpa [#allocation9], 1 }
 0x45b   :  { %1901 = vsyncpa [#allocation4], 1 }

</bundles_post_ra>
